<compile_context>
chip_gen: v7x
topology: tpu7x:2x2x1
jax: 0.10.0
libtpu: 0.0.40
codegen_flags: <defaults>
</compile_context>

<pallas_src>
import math
import functools

import jax
import jax.numpy as jnp
from jax.experimental import pallas as pl
from jax.experimental.pallas import tpu as pltpu


# ---------------------------------------------------------------------------
# Buffer construction (plain JAX) — mirrors PositionalEncoding.__init__.
# ---------------------------------------------------------------------------
def build_pe(d_model: int, max_len: int = 5000, dtype=jnp.float32) -> jnp.ndarray:
    position = jnp.arange(max_len, dtype=jnp.float32)[:, None]              # (max_len, 1)
    div_term = jnp.exp(
        jnp.arange(0, d_model, 2, dtype=jnp.float32) * (-math.log(10000.0) / d_model)
    )                                                                        # (d_model/2,)
    pe = jnp.zeros((max_len, d_model), dtype=jnp.float32)
    pe = pe.at[:, 0::2].set(jnp.sin(position * div_term))
    pe = pe.at[:, 1::2].set(jnp.cos(position * div_term))
    # torch: pe.unsqueeze(0).transpose(0, 1) -> (max_len, 1, d_model)
    return pe[:, None, :].astype(dtype)   # build in the activation dtype at init


# ---------------------------------------------------------------------------
# Kernels.  Blocks are lane-dense 2-D views: x/out (ts, B*D), pe (ts, D).
# `use_slices=True` (D % 128 == 0) avoids materializing the batch-broadcast
# of pe: each batch's D-wide lane slab is added and stored directly.
# ---------------------------------------------------------------------------
def pe_add_kernel(x_ref, pe_ref, o_ref, *, batch, d_model, use_slices):
    if use_slices:
        pe = pe_ref[...]
        for b in range(batch):                     # static unroll, lane-aligned slices
            sl = pl.ds(b * d_model, d_model)
            o_ref[:, sl] = (x_ref[:, sl] + pe).astype(o_ref.dtype)
    else:
        pe_b = jnp.tile(pe_ref[...], (1, batch))   # only when D is not a multiple of 128
        o_ref[...] = (x_ref[...] + pe_b).astype(o_ref.dtype)


def pe_add_dropout_kernel(seed_ref, x_ref, pe_ref, o_ref, *,
                          batch, d_model, keep_threshold, scale, use_slices):
    # Two hardware seeds (user seed, tile id): distinct streams per tile,
    # no int32 overflow / cross-seed collisions.
    pltpu.prng_seed(seed_ref[0], pl.program_id(0))
    thresh = jnp.uint32(keep_threshold)

    # P(drop) = keep_threshold / 2^32 = p  (integer compare: no shift/convert/mul)
    # TODO(synk): for sub-32-bit dtypes, halve PRNG volume by comparing both
    #             16-bit halves of each uint32 word (only matters on v7x).
    def drop(y):
        bits = pltpu.bitcast(pltpu.prng_random_bits(y.shape), jnp.uint32)
        keep = bits >= thresh
        return jnp.where(keep, y * scale, jnp.zeros_like(y))

    if use_slices:
        pe = pe_ref[...]
        for b in range(batch):
            sl = pl.ds(b * d_model, d_model)
            o_ref[:, sl] = drop(x_ref[:, sl] + pe).astype(o_ref.dtype)
    else:
        pe_b = jnp.tile(pe_ref[...], (1, batch))
        o_ref[...] = drop(x_ref[...] + pe_b).astype(o_ref.dtype)


def pe_add_dropout_hostbits_kernel(x_ref, pe_ref, bits_ref, o_ref, *,
                                   batch, d_model, keep_threshold, scale, use_slices):
    # Fallback for non-TPU backends / interpret mode: the Mosaic on-chip PRNG
    # has no CPU lowering, so pre-drawn uint32 bits are streamed in instead.
    thresh = jnp.uint32(keep_threshold)
    if use_slices:
        pe = pe_ref[...]
        for b in range(batch):
            sl = pl.ds(b * d_model, d_model)
            y = x_ref[:, sl] + pe
            keep = bits_ref[:, sl] >= thresh
            o_ref[:, sl] = jnp.where(keep, y * scale, jnp.zeros_like(y)).astype(o_ref.dtype)
    else:
        pe_b = jnp.tile(pe_ref[...], (1, batch))
        y = x_ref[...] + pe_b
        keep = bits_ref[...] >= thresh
        o_ref[...] = jnp.where(keep, y * scale, jnp.zeros_like(y)).astype(o_ref.dtype)


# ---------------------------------------------------------------------------
# Generation-aware tile selection (purely HBM-bandwidth-bound op).
# ---------------------------------------------------------------------------
def _tpu_kind() -> str:
    try:
        d = jax.devices()[0]
        if d.platform == "tpu":
            return d.device_kind.lower()
    except Exception:
        pass
    return ""


def _gen_params():
    """Returns (target x-block bytes, VMEM working-set cap in bytes)."""
    kind = _tpu_kind()
    if "v7" in kind:
        # 64 MiB VMEM / TC: 4 MiB blocks (~amortizes the 0.35 µs/step overhead
        # at 3.2 TB/s) while keeping the double-buffered working set << 48 MiB.
        return 4 * 1024 * 1024, 48 * 1024 * 1024
    # v5e / v6e (128 MiB VMEM): bigger blocks, more headroom.
    return 8 * 1024 * 1024, 100 * 1024 * 1024


def _choose_seq_tile(seq_len, row_bytes, itemsize, target_bytes):
    # Choose by bytes only (no row cap), then align to the dtype's sublane
    # packing: 8 rows for 4-byte, 16 for 2-byte, 32 for 1-byte dtypes.
    align = 8 * max(1, 4 // max(int(itemsize), 1))
    rows = max(1, target_bytes // max(row_bytes, 1))
    if rows >= seq_len:
        return seq_len                       # single block == full dim (always legal)
    if rows >= align:
        return (rows // align) * align
    return min(align, seq_len)               # very wide rows: smallest aligned tile


# ---------------------------------------------------------------------------
# Wrapper (forward pass)
# ---------------------------------------------------------------------------
def positional_encoding_forward(x, pe, *, p=0.1, training=False, seed=0):
    """x: (S, B, D); pe: (max_len, 1, D). Returns dropout(x + pe[:S])."""
    S, B, D = x.shape
    item = x.dtype.itemsize

    # Slice to [:S] BEFORE any cast so we never touch the full (max_len, D)
    # table per call; build_pe(dtype=...) makes the cast a no-op entirely.
    pe2 = pe.reshape(pe.shape[0], D)[:S]
    if pe2.dtype != x.dtype:
        pe2 = pe2.astype(x.dtype)
    x2 = x.reshape(S, B * D)                 # lane-dense 2-D view (free bitcast)

    target_bytes, vmem_cap = _gen_params()
    row_bytes = B * D * item
    ts = _choose_seq_tile(S, row_bytes, item, target_bytes)
    grid = (pl.cdiv(S, ts),)
    use_slices = (D % 128 == 0)              # lane-aligned per-batch slabs

    x_spec = pl.BlockSpec((ts, B * D), lambda i, *_: (i, 0))
    pe_spec = pl.BlockSpec((ts, D), lambda i, *_: (i, 0))
    out_spec = pl.BlockSpec((ts, B * D), lambda i, *_: (i, 0))
    out_shape = jax.ShapeDtypeStruct((S, B * D), x.dtype)

    x_block = ts * B * D * item
    pe_block = ts * D * item

    def _compiler_params(extra_block_bytes=0):
        # Double-buffered x-in + out + pe (+ optional bits input) + slack.
        needed = 2 * (2 * x_block + pe_block + extra_block_bytes)
        limit = int(min(max(needed + (4 << 20), 32 << 20), vmem_cap))
        # TODO(synk): if `needed` itself exceeds the cap (huge B*D rows), also
        #             tile the lane axis instead of relying on tiny seq tiles.
        return pltpu.CompilerParams(
            # TODO(synk): verify v7x megacore sharding; try pltpu.CORE_PARALLEL
            #             on the seq axis if "parallel" doesn't split across TCs.
            dimension_semantics=("parallel",),
            vmem_limit_bytes=limit,
        )

    bytes_moved = 2 * S * B * D * item + S * D * item   # x read + out write + pe read

    # --- eval mode / p == 0: nn.Dropout is identity --------------------------
    if (not training) or p == 0.0:
        out2 = pl.pallas_call(
            functools.partial(pe_add_kernel, batch=B, d_model=D, use_slices=use_slices),
            out_shape=out_shape,
            grid_spec=pltpu.PrefetchScalarGridSpec(
                num_scalar_prefetch=0, grid=grid,
                in_specs=[x_spec, pe_spec], out_specs=out_spec),
            compiler_params=_compiler_params(),
            cost_estimate=pl.CostEstimate(
                flops=S * B * D, transcendentals=0, bytes_accessed=bytes_moved),
        )(x2, pe2)
        return out2.reshape(S, B, D)

    # --- training mode --------------------------------------------------------
    if p >= 1.0:
        return jnp.zeros_like(x)             # torch: dropout(p=1) zeroes everything

    # TODO(synk): RNG stream differs from torch's dropout RNG (semantics match:
    #             keep-prob 1-p, kept values scaled by 1/(1-p)).
    keep_threshold = min(int(round(float(p) * float(2 ** 32))), 2 ** 32 - 1)
    scale = float(1.0 / (1.0 - float(p)))

    if jax.default_backend() == "tpu":
        seed_arr = jnp.asarray([seed], dtype=jnp.int32)
        out2 = pl.pallas_call(
            functools.partial(pe_add_dropout_kernel, batch=B, d_model=D,
                              keep_threshold=keep_threshold, scale=scale,
                              use_slices=use_slices),
            out_shape=out_shape,
            grid_spec=pltpu.PrefetchScalarGridSpec(
                num_scalar_prefetch=1,        # seed lands in SMEM
                grid=grid,
                in_specs=[x_spec, pe_spec], out_specs=out_spec),
            compiler_params=_compiler_params(),
            cost_estimate=pl.CostEstimate(
                flops=3 * S * B * D, transcendentals=0, bytes_accessed=bytes_moved),
        )(seed_arr, x2, pe2)
    else:
        # Non-TPU (e.g. CPU interpret) fallback: host-drawn uint32 bits.
        bits = jax.random.bits(jax.random.PRNGKey(seed), (S, B * D), dtype=jnp.uint32)
        bits_spec = pl.BlockSpec((ts, B * D), lambda i, *_: (i, 0))
        out2 = pl.pallas_call(
            functools.partial(pe_add_dropout_hostbits_kernel, batch=B, d_model=D,
                              keep_threshold=keep_threshold, scale=scale,
                              use_slices=use_slices),
            out_shape=out_shape,
            grid_spec=pltpu.PrefetchScalarGridSpec(
                num_scalar_prefetch=0, grid=grid,
                in_specs=[x_spec, pe_spec, bits_spec], out_specs=out_spec),
            compiler_params=_compiler_params(extra_block_bytes=ts * B * D * 4),
            cost_estimate=pl.CostEstimate(
                flops=3 * S * B * D, transcendentals=0,
                bytes_accessed=bytes_moved + 4 * S * B * D),
        )(x2, pe2, bits)
    return out2.reshape(S, B, D)


# ---------------------------------------------------------------------------
# Demo / self-check
# ---------------------------------------------------------------------------
if __name__ == "__main__":
    d_model = 32
    seq_len = 8
    batch = 2
    max_len = 64  # small but > seq_len; same construction as max_len=5000

    key = jax.random.PRNGKey(0)
    x = jax.random.normal(key, (seq_len, batch, d_model), dtype=jnp.float32)
    pe = build_pe(d_model, max_len=max_len, dtype=x.dtype)   # cast hoisted to init

    # Eval-mode forward (dropout == identity), computed by the Pallas kernel.
    out = positional_encoding_forward(x, pe, p=0.1, training=False)
    out = jax.block_until_ready(out)

    ref = x + pe[:seq_len]
    assert out.shape == (seq_len, batch, d_model)
    assert out.dtype == x.dtype
    assert jnp.allclose(out, ref, atol=1e-6, rtol=1e-6)

    # Training-mode forward: every element is either 0 or (x+pe)/(1-p).
    p = 0.5
    out_tr = positional_encoding_forward(x, pe, p=p, training=True, seed=123)
    out_tr = jax.block_until_ready(out_tr)
    scaled = ref / (1.0 - p)
    dropped = out_tr == 0.0
    kept = jnp.isclose(out_tr, scaled, atol=1e-5, rtol=1e-5)
    assert out_tr.shape == (seq_len, batch, d_model)
    assert bool(jnp.all(dropped | kept))

    # p = 1.0 edge case: all zeros (matches torch).
    out_p1 = jax.block_until_ready(
        positional_encoding_forward(x, pe, p=1.0, training=True, seed=7))
    assert bool(jnp.all(out_p1 == 0.0))

    print("KERNEL_OK")
</pallas_src>

<mosaic_0001>
module attributes {stable_mosaic.version = 11 : i64} {
  func.func @pe_add_kernel(%arg0: i32, %arg1: memref<8x64xf32, #tpu.memory_space<vmem>>, %arg2: memref<8x32xf32, #tpu.memory_space<vmem>>, %arg3: memref<8x64xf32, #tpu.memory_space<vmem>>) attributes {dimension_semantics = [#tpu.dimension_semantics<parallel>], iteration_bounds = array<i64: 1>, scalar_prefetch = 0 : i64, scratch_operands = 0 : i64, tpu.core_type = #tpu.core_type<tc>, window_params = [{transform_indices = @transform_0, window_bounds = array<i64: 8, 64>}, {transform_indices = @transform_1, window_bounds = array<i64: 8, 32>}, {transform_indices = @transform_2, window_bounds = array<i64: 8, 64>}]} {
    %c0 = arith.constant 0 : index
    %c0_0 = arith.constant 0 : index
    %0 = vector.load %arg2[%c0, %c0_0] : memref<8x32xf32, #tpu.memory_space<vmem>>, vector<8x32xf32>
    %1 = tpu.concatenate %0, %0 in 1 : vector<8x32xf32>, vector<8x32xf32> -> vector<8x64xf32>
    %c0_1 = arith.constant 0 : index
    %c0_2 = arith.constant 0 : index
    %2 = vector.load %arg1[%c0_1, %c0_2] : memref<8x64xf32, #tpu.memory_space<vmem>>, vector<8x64xf32>
    %3 = arith.addf %2, %1 : vector<8x64xf32>
    %c0_3 = arith.constant 0 : index
    %c0_4 = arith.constant 0 : index
    %4 = vector.load %arg3[%c0_3, %c0_4] : memref<8x64xf32, #tpu.memory_space<vmem>>, vector<8x64xf32>
    tpu.vector_store %arg3[%c0_3, %c0_4], %3 {strides = array<i32>} : memref<8x64xf32, #tpu.memory_space<vmem>>, vector<8x64xf32>,
    return
  }
  func.func @transform_0(%arg0: i32) -> (i32, i32) {
    %c0_i32 = arith.constant 0 : i32
    %c0_i32_0 = arith.constant 0 : i32
    return %arg0, %c0_i32 : i32, i32
  }
  func.func @transform_1(%arg0: i32) -> (i32, i32) {
    %c0_i32 = arith.constant 0 : i32
    %c0_i32_0 = arith.constant 0 : i32
    return %arg0, %c0_i32 : i32, i32
  }
  func.func @transform_2(%arg0: i32) -> (i32, i32) {
    %c0_i32 = arith.constant 0 : i32
    %c0_i32_0 = arith.constant 0 : i32
    return %arg0, %c0_i32 : i32, i32
  }
}

</mosaic_0001>

<bundles_post_ra>
// kernel: tpu_custom_call.1
= control target key start
LH: loop header
LB: loop body
LE: loop exit
PB: predicated region body
PF: predicated region fallthrough
CT: control target
= control target key end

     0   :  { %7 = vsyncpa [#allocation3], 0  ;;  %s194_s0 = inlined_call_operand.hbm [shape: f32[8,64], index: 0, kind: input, shape index: {}]   ;;  %s195_s1 = inlined_call_operand.hbm [shape: f32[8,32], index: 1, kind: input, shape index: {}]   ;;  %s196_s2 = inlined_call_operand.hbm [shape: f32[8,64], index: 2, kind: output, shape index: {}]  }
   0x1   :  { %8 = vsyncpa [#allocation6], 0 }
   0x2   :  { %9 = vsyncpa [#allocation4], 0  ;;  %s139_s9 = smov [#allocation2]   ;;  %s140_s11 = smov [#allocation5]  }
   0x3   :  { %s16_s10 = sshll.u32 %s139_s9, 4  ;;  %s26_s12 = sshll.u32 %s140_s11, 4  ;;  %s17_s10 = int_to_ptr.vmem [resolvable:$true] %s16_s10  ;;  %s27_s12 = int_to_ptr.vmem [resolvable:$true] %s26_s12 }
   0x4   :  { %s67_s15 = scalar_lea.hbm %s194_s0, 128 }
   0x5   :  { %p68_p0 = scmp.ne.s32.totalorder %s194_s0, %s67_s15  ;;  %p71_p1 = scmp.lt.u32.totalorder %s67_s15, %s194_s0 }
   0x7   :  { %p73_p2 = pnand %p71_p1, %p68_p0 }
   0x9   :  { %76 = shalt.err (!%p73_p2)
}
   0xa   :  { %s77_s20 = scalar_lea.vmem %s17_s10, 128  ;;  %p82_p4 = scmp.lt.s32.totalorder %s17_s10, %s17_s10 }
   0xb   :  { %p78_p3 = scmp.ne.s32.totalorder %s17_s10, %s77_s20  ;;  %p83_p5 = scmp.lt.s32.totalorder %s77_s20, %s77_s20 }
   0xd   :  { %p84_p6 = por %p83_p5, %p82_p4 }
   0xf   :  { %p85_p7 = pnand %p84_p6, %p78_p3 }
  0x11   :  { %88 = shalt.err (!%p85_p7)
}
  0x12   :  { %19 = dma.hbm_to_vmem [thread:$0]  %s194_s0, 128, %s17_s10, [#allocation3]  }
  0x13   :  { %s89_s25 = scalar_lea.hbm %s195_s1, 128 }
  0x14   :  { %p90_p8 = scmp.ne.s32.totalorder %s195_s1, %s89_s25  ;;  %p93_p9 = scmp.lt.u32.totalorder %s89_s25, %s195_s1 }
  0x16   :  { %p95_p10 = pnand %p93_p9, %p90_p8 }
  0x18   :  { %98 = shalt.err (!%p95_p10)
}
  0x19   :  { %s99_s30 = scalar_lea.vmem %s27_s12, 128  ;;  %p104_p12 = scmp.lt.s32.totalorder %s27_s12, %s27_s12 }
  0x1a   :  { %p100_p11 = scmp.ne.s32.totalorder %s27_s12, %s99_s30  ;;  %p105_p13 = scmp.lt.s32.totalorder %s99_s30, %s99_s30 }
  0x1c   :  { %p106_p0 = por %p105_p13, %p104_p12 }
  0x1e   :  { %p107_p1 = pnand %p106_p0, %p100_p11 }
  0x20   :  { %110 = shalt.err (!%p107_p1)
}
  0x21   :  { %29 = dma.hbm_to_vmem [thread:$0]  %s195_s1, 128, %s27_s12, [#allocation6]  }
  0x22   :  { %133 = dma.done.wait [#allocation3], 128  }
  0x23   :  { %134 = vsyncadd [#allocation3], 4294967168 }
  0x24   :  { %135 = dma.done.wait [#allocation6], 128  }
  0x25   :  { %136 = vsyncadd [#allocation6], 4294967168  ;;  %v36_v0 = vld [vmem:[#allocation5] sm:$0xff]  ;;  %s141_s4 = smov 32   ;;  %vm41_vm0 = vcmask 261120   ;;  %v43_v1 = vld [vmem:[#allocation2] sm:$0xff] }
  0x26   :  { %38 = vrot.lane.b32.xlu0 %v36_v0, %s141_s4  ;;  %s142_s5 = smov [#allocation7]   ;;  %vm45_vm1 = vcmask 523264  }
  0x27   :  { %s53_s6 = sshll.u32 %s142_s5, 4  ;;  %s54_s6 = int_to_ptr.vmem [resolvable:$true] %s53_s6 }
  0x28   :  { %s111_s7 = scalar_lea.vmem %s54_s6, 128  ;;  %p116_p3 = scmp.lt.s32.totalorder %s54_s6, %s54_s6 }
  0x29   :  { %p112_p2 = scmp.ne.s32.totalorder %s54_s6, %s111_s7  ;;  %p117_p4 = scmp.lt.s32.totalorder %s111_s7, %s111_s7 }
  0x2b   :  { %p118_p5 = por %p117_p4, %p116_p3 }
  0x2d   :  { %p119_p6 = pnand %p118_p5, %p112_p2 }
  0x98   :  { %v39_v2 = vpop.permute.xlu0 %38 }
  0x99   :  { %v42_v3 = vsel %vm41_vm0, %v36_v0, %v39_v2 }
  0x9a   :  { %v44_v4 = vadd.f32 %v43_v1, %v42_v3 }
  0x9c   :  { %46 = vst.msk [vmem:[#allocation7] sm:$0xff] %vm45_vm1, %v44_v4 }
  0x9d   :  { %122 = shalt.err (!%p119_p6)
}
  0x9e   :  { %s123_s9 = scalar_lea.hbm %s196_s2, 128 }
  0x9f   :  { %p124_p7 = scmp.ne.s32.totalorder %s196_s2, %s123_s9  ;;  %p127_p8 = scmp.lt.u32.totalorder %s123_s9, %s196_s2 }
  0xa1   :  { %p129_p9 = pnand %p127_p8, %p124_p7 }
  0xa3   :  { %132 = shalt.err (!%p129_p9)
}
  0xa4   :  { %56 = dma.vmem_to_hbm [thread:$0]  %s54_s6, 128, %s196_s2, [#allocation4]  }
  0xa5   :  { %137 = dma.done.wait [#allocation4], 128  }
  0xa6   :  { %138 = vsyncadd [#allocation4], 4294967168 }
  0xa7   :  { %60 = vsyncpa [#allocation3], 1 }
  0xa8   :  { %61 = vsyncpa [#allocation6], 1 }
  0xa9   :  { %62 = vsyncpa [#allocation4], 1 }

</bundles_post_ra>
